<compile_context>
chip_gen: v5e
topology: v5e:2x2
jax: 0.10.0
libtpu: 0.0.40
codegen_flags: <defaults>
</compile_context>

<pallas_src>
import math
import functools

import jax
import jax.numpy as jnp
from jax.experimental import pallas as pl
from jax.experimental.pallas import tpu as pltpu


# --------------------------------------------------------------------------- #
# Kernel                                                                       #
# --------------------------------------------------------------------------- #
def _attn_group_kernel(h_ref, mask_ref, wqkv_ref, bqkv_ref, out_ref, *,
                       head_dim, head_group):
    """One (batch, head-group) pair per grid step.

    h_ref    : (1, S, H)                bf16   hidden states for batch b
    mask_ref : (1, 1, S)                f32    additive BERT mask for batch b
    wqkv_ref : (num_groups, H, 3*G*d)   bf16   VMEM-resident packed weights
    bqkv_ref : (num_groups, 1, 3*G*d)   f32    VMEM-resident packed biases
    out_ref  : (1, S, G*d)              block of the merged (B, S, H) context
    """
    g = pl.program_id(1)

    h = h_ref[0]                      # (S, H)       bf16
    w = wqkv_ref[g]                   # (H, 3*G*d)   bf16 (1/sqrt(d) folded in Wq)
    b = bqkv_ref[g]                   # (1, 3*G*d)   f32
    mask = mask_ref[0]                # (1, S)       f32, broadcast over queries

    # Fused projection for all G heads of this group: one MXU matmul, f32 acc.
    qkv = jnp.dot(h, w, preferred_element_type=jnp.float32) + b   # (S, 3*G*d)

    d = head_dim
    ctxs = []
    for j in range(head_group):       # small static unroll (G <= num_heads)
        off = 3 * d * j
        q = qkv[:, off + 0 * d:off + 1 * d].astype(jnp.bfloat16)
        k = qkv[:, off + 1 * d:off + 2 * d].astype(jnp.bfloat16)
        v = qkv[:, off + 2 * d:off + 3 * d].astype(jnp.bfloat16)

        # scores = q @ k^T (contract over head_dim) -> (S, S) f32.
        scores = jax.lax.dot_general(q, k, (((1,), (1,)), ((), ())),
                                     preferred_element_type=jnp.float32)
        scores = scores + mask

        # Numerically stable softmax; divide goes to the EUP (approx reciprocal).
        m = jnp.max(scores, axis=-1, keepdims=True)
        e = jnp.exp(scores - m)
        probs = e * pl.reciprocal(jnp.sum(e, axis=-1, keepdims=True), approx=True)
        # TODO(synk): attention_probs dropout is identity in eval mode; training
        #             would use pltpu.prng_seed / pltpu.prng_random_bits here.
        # TODO(synk): for S >~ 1k (especially on v7x's 64 MiB VMEM) switch this
        #             region to a flash-style KV-tiled online softmax instead of
        #             materializing the full (S, S) scores per step.

        ctxs.append(jnp.dot(probs.astype(jnp.bfloat16), v,
                            preferred_element_type=jnp.float32))   # (S, d) f32

    ctx = ctxs[0] if head_group == 1 else jnp.concatenate(ctxs, axis=-1)
    # Single lane-dense store of (S, G*d) directly into the merged (B, S, H) out.
    out_ref[0] = ctx.astype(out_ref.dtype)


# --------------------------------------------------------------------------- #
# Host-side helpers                                                            #
# --------------------------------------------------------------------------- #
def _choose_head_group(num_heads, head_dim):
    """Smallest divisor G of num_heads with G*head_dim % 128 == 0, else num_heads."""
    for g in range(1, num_heads + 1):
        if num_heads % g == 0 and (g * head_dim) % 128 == 0:
            return g
    return num_heads


def _default_vmem_limit_bytes():
    """~3/4 of physical VMEM: ~96 MiB on v5e/v6e, ~48 MiB on v7x; safe fallback."""
    try:
        cap = pltpu.get_tpu_info().vmem_capacity_bytes
        return min(int(cap * 3 // 4), 112 * 1024 * 1024)
    except Exception:
        return 48 * 1024 * 1024


def pack_qkv_weights(wq, bq, wk, bk, wv, bv, *, num_heads, head_group=None):
    """Pack Wq|Wk|Wv into (num_groups, H, G*3d) / biases into (num_groups, 1, G*3d).

    Weights are expected in "math" orientation (y = x @ W + b, i.e. PyTorch
    nn.Linear weight transposed).  1/sqrt(head_dim) is folded into Wq and bq.
    Call ONCE and reuse the packed tensors across forward calls.
    """
    H = wq.shape[0]
    assert H % num_heads == 0
    d = H // num_heads
    if head_group is None:
        head_group = _choose_head_group(num_heads, d)
    assert num_heads % head_group == 0
    num_groups = num_heads // head_group
    scale = 1.0 / math.sqrt(d)

    def split_heads(w):                      # (H, H) -> (num_heads, H, d)
        return w.reshape(H, num_heads, d).transpose(1, 0, 2)

    # Per-head [Wq|Wk|Wv] -> (num_heads, H, 3d); scale folded into the Q columns.
    w_per_head = jnp.concatenate(
        [split_heads(wq) * scale, split_heads(wk), split_heads(wv)], axis=-1)
    wqkv = (w_per_head
            .reshape(num_groups, head_group, H, 3 * d)
            .transpose(0, 2, 1, 3)
            .reshape(num_groups, H, head_group * 3 * d)
            .astype(jnp.bfloat16))

    b_per_head = jnp.concatenate(
        [(bq * scale).reshape(num_heads, d),
         bk.reshape(num_heads, d),
         bv.reshape(num_heads, d)], axis=-1)                 # (num_heads, 3d)
    bqkv = (b_per_head
            .reshape(num_groups, 1, head_group * 3 * d)
            .astype(jnp.float32))

    return wqkv, bqkv, head_group


def bert_self_attention_packed(hidden_states, attention_mask, wqkv, bqkv, *,
                               num_heads, head_group, out_dtype=jnp.float32,
                               vmem_limit_bytes=None):
    """hidden_states: (B, S, H); attention_mask: (B, 1, S) additive mask.

    Returns the merged context layer (B, S, H) — identical layout to the
    PyTorch module's permute(0,2,1,3).view(B, S, H) output.
    """
    B, S, H = hidden_states.shape
    assert H % num_heads == 0
    d = H // num_heads
    assert num_heads % head_group == 0
    num_groups = num_heads // head_group
    gd = head_group * d
    if vmem_limit_bytes is None:
        vmem_limit_bytes = _default_vmem_limit_bytes()

    h_bf16 = hidden_states.astype(jnp.bfloat16)
    mask_f32 = attention_mask.astype(jnp.float32)

    kernel = functools.partial(_attn_group_kernel, head_dim=d,
                               head_group=head_group)

    return pl.pallas_call(
        kernel,
        out_shape=jax.ShapeDtypeStruct((B, S, H), out_dtype),
        grid_spec=pltpu.PrefetchScalarGridSpec(
            num_scalar_prefetch=0,
            grid=(B, num_groups),                 # batch outer, head-group inner
            in_specs=[
                # hidden / mask block index is constant over the inner group
                # axis -> DMA'd once per batch element, reused for every group.
                pl.BlockSpec((1, S, H), lambda b, g: (b, 0, 0)),          # hidden
                pl.BlockSpec((1, 1, S), lambda b, g: (b, 0, 0)),          # mask
                # Weights/biases: full-array blocks with a constant index_map
                # -> fully VMEM-resident, DMA'd from HBM exactly once.
                pl.BlockSpec((num_groups, H, 3 * gd), lambda b, g: (0, 0, 0)),
                pl.BlockSpec((num_groups, 1, 3 * gd), lambda b, g: (0, 0, 0)),
            ],
            # Lane-dense output block: last dim G*d is a multiple of 128 (or the
            # full H), written straight into the merged (B, S, H) layout.
            out_specs=pl.BlockSpec((1, S, gd), lambda b, g: (b, 0, g)),
        ),
        compiler_params=pltpu.CompilerParams(
            dimension_semantics=("parallel", "parallel"),
            vmem_limit_bytes=vmem_limit_bytes,
        ),
    )(h_bf16, mask_f32, wqkv, bqkv)


def bert_self_attention(hidden_states, attention_mask,
                        wq, bq, wk, bk, wv, bv, *, num_heads,
                        out_dtype=jnp.float32, vmem_limit_bytes=None):
    """Convenience wrapper that packs weights then calls the kernel.
    For repeated forward passes, call pack_qkv_weights() once and use
    bert_self_attention_packed() directly."""
    wqkv, bqkv, head_group = pack_qkv_weights(wq, bq, wk, bk, wv, bv,
                                              num_heads=num_heads)
    return bert_self_attention_packed(hidden_states, attention_mask, wqkv, bqkv,
                                      num_heads=num_heads, head_group=head_group,
                                      out_dtype=out_dtype,
                                      vmem_limit_bytes=vmem_limit_bytes)


# --------------------------------------------------------------------------- #
# Pure-JAX reference                                                           #
# --------------------------------------------------------------------------- #
def _reference(hidden_states, attention_mask, wq, bq, wk, bk, wv, bv, num_heads):
    B, S, H = hidden_states.shape
    hd = H // num_heads
    q = hidden_states @ wq + bq
    k = hidden_states @ wk + bk
    v = hidden_states @ wv + bv

    def split(x):
        return x.reshape(B, S, num_heads, hd).transpose(0, 2, 1, 3)

    qh, kh, vh = split(q), split(k), split(v)
    scores = jnp.einsum('bhqd,bhkd->bhqk', qh, kh) / math.sqrt(hd)
    scores = scores + attention_mask[:, None, :, :]   # (B,1,1,S) broadcast
    probs = jax.nn.softmax(scores, axis=-1)
    ctx = jnp.einsum('bhqk,bhkd->bhqd', probs, vh)
    return ctx.transpose(0, 2, 1, 3).reshape(B, S, H)


if __name__ == "__main__":
    # config: hidden_size=32, num_attention_heads=4, seq=8, batch=2
    B, S, H, NH = 2, 8, 32, 4

    key = jax.random.PRNGKey(0)
    ks = jax.random.split(key, 8)
    hidden = jax.random.normal(ks[0], (B, S, H), jnp.float32)
    # BERT-style additive mask: 0 for attended tokens, -10000 for masked ones.
    mask_bits = (jax.random.uniform(ks[1], (B, 1, S)) < 0.8).astype(jnp.float32)
    attn_mask = (1.0 - mask_bits) * -10000.0

    scale = 1.0 / math.sqrt(H)
    wq = jax.random.normal(ks[2], (H, H), jnp.float32) * scale
    wk = jax.random.normal(ks[3], (H, H), jnp.float32) * scale
    wv = jax.random.normal(ks[4], (H, H), jnp.float32) * scale
    bq = jax.random.normal(ks[5], (H,), jnp.float32) * 0.01
    bk = jax.random.normal(ks[6], (H,), jnp.float32) * 0.01
    bv = jax.random.normal(ks[7], (H,), jnp.float32) * 0.01

    # Pack once (hoisted out of the per-call path), then run the kernel.
    wqkv, bqkv, head_group = pack_qkv_weights(wq, bq, wk, bk, wv, bv, num_heads=NH)
    out = bert_self_attention_packed(hidden, attn_mask, wqkv, bqkv,
                                     num_heads=NH, head_group=head_group)
    out = jax.block_until_ready(out)

    ref = _reference(hidden, attn_mask, wq, bq, wk, bk, wv, bv, NH)
    # bf16 MXU inputs + approx reciprocal -> ~1e-2 relative accuracy expected.
    assert out.shape == ref.shape
    assert jnp.allclose(out, ref, atol=5e-2, rtol=5e-2), "mismatch vs reference"

    print("KERNEL_OK")
</pallas_src>

<mosaic_0001>
module attributes {stable_mosaic.version = 11 : i64} {
  func.func @_attn_group_kernel(%arg0: i32, %arg1: i32, %arg2: memref<1x8x32xbf16, #tpu.memory_space<vmem>>, %arg3: memref<1x1x8xf32, #tpu.memory_space<vmem>>, %arg4: memref<1x32x96xbf16, #tpu.memory_space<vmem>>, %arg5: memref<1x1x96xf32, #tpu.memory_space<vmem>>, %arg6: memref<1x8x32xf32, #tpu.memory_space<vmem>>) attributes {dimension_semantics = [#tpu.dimension_semantics<parallel>, #tpu.dimension_semantics<parallel>], iteration_bounds = array<i64: 2, 1>, scalar_prefetch = 0 : i64, scratch_operands = 0 : i64, tpu.core_type = #tpu.core_type<tc>, window_params = [{transform_indices = @transform_0, window_bounds = array<i64: 1, 8, 32>}, {transform_indices = @transform_1, window_bounds = array<i64: 1, 1, 8>}, {pipeline_mode = #tpu.pipeline_mode<synchronous>, transform_indices = @transform_2, window_bounds = array<i64: 1, 32, 96>}, {pipeline_mode = #tpu.pipeline_mode<synchronous>, transform_indices = @transform_3, window_bounds = array<i64: 1, 1, 96>}, {transform_indices = @transform_4, window_bounds = array<i64: 1, 8, 32>}]} {
    %c0 = arith.constant 0 : index
    %c0_0 = arith.constant 0 : index
    %c0_1 = arith.constant 0 : index
    %0 = vector.load %arg2[%c0, %c0_0, %c0_1] : memref<1x8x32xbf16, #tpu.memory_space<vmem>>, vector<1x8x32xbf16>
    %1 = vector.shape_cast %0 : vector<1x8x32xbf16> to vector<8x32xbf16>
    %2 = arith.index_cast %arg1 : i32 to index
    %c0_2 = arith.constant 0 : index
    %c0_3 = arith.constant 0 : index
    %3 = vector.load %arg4[%2, %c0_2, %c0_3] : memref<1x32x96xbf16, #tpu.memory_space<vmem>>, vector<1x32x96xbf16>
    %4 = vector.shape_cast %3 : vector<1x32x96xbf16> to vector<32x96xbf16>
    %5 = arith.index_cast %arg1 : i32 to index
    %c0_4 = arith.constant 0 : index
    %c0_5 = arith.constant 0 : index
    %6 = vector.load %arg5[%5, %c0_4, %c0_5] : memref<1x1x96xf32, #tpu.memory_space<vmem>>, vector<1x1x96xf32>
    %7 = vector.shape_cast %6 : vector<1x1x96xf32> to vector<1x96xf32>
    %c0_6 = arith.constant 0 : index
    %c0_7 = arith.constant 0 : index
    %c0_8 = arith.constant 0 : index
    %8 = vector.load %arg3[%c0_6, %c0_7, %c0_8] : memref<1x1x8xf32, #tpu.memory_space<vmem>>, vector<1x1x8xf32>
    %9 = vector.shape_cast %8 : vector<1x1x8xf32> to vector<1x8xf32>
    %cst = arith.constant dense<0.000000e+00> : vector<8x96xf32>
    %10 = tpu.matmul %1, %4, %cst {dimension_numbers = #tpu.dot_dimension_numbers<[1], [0], [0], [1], [0, 0, 1, 1], [], []>} : vector<8x32xbf16>, vector<32x96xbf16>, vector<8x96xf32> -> vector<8x96xf32>
    %11 = vector.broadcast %7 : vector<1x96xf32> to vector<8x96xf32>
    %12 = arith.addf %10, %11 : vector<8x96xf32>
    %13 = vector.extract_strided_slice %12 {offsets = [0, 0], sizes = [8, 8], strides = [1, 1]} : vector<8x96xf32> to vector<8x8xf32>
    %14 = arith.truncf %13 : vector<8x8xf32> to vector<8x8xbf16>
    %15 = vector.extract_strided_slice %12 {offsets = [0, 8], sizes = [8, 8], strides = [1, 1]} : vector<8x96xf32> to vector<8x8xf32>
    %16 = arith.truncf %15 : vector<8x8xf32> to vector<8x8xbf16>
    %17 = vector.extract_strided_slice %12 {offsets = [0, 16], sizes = [8, 8], strides = [1, 1]} : vector<8x96xf32> to vector<8x8xf32>
    %18 = arith.truncf %17 : vector<8x8xf32> to vector<8x8xbf16>
    %cst_9 = arith.constant dense<0.000000e+00> : vector<8x8xf32>
    %19 = tpu.matmul %14, %16, %cst_9 {dimension_numbers = #tpu.dot_dimension_numbers<[1], [1], [0], [0], [0, 0, 1, 0], [], []>} : vector<8x8xbf16>, vector<8x8xbf16>, vector<8x8xf32> -> vector<8x8xf32>
    %20 = vector.broadcast %9 : vector<1x8xf32> to vector<8x8xf32>
    %21 = arith.addf %19, %20 : vector<8x8xf32>
    %cst_10 = arith.constant dense<0xFF800000> : vector<8xf32>
    %22 = vector.multi_reduction <maximumf>, %21, %cst_10 [1] : vector<8x8xf32> to vector<8xf32>
    %23 = vector.shape_cast %22 : vector<8xf32> to vector<8x1xf32>
    %24 = vector.broadcast %23 : vector<8x1xf32> to vector<8x8xf32>
    %25 = arith.subf %21, %24 : vector<8x8xf32>
    %26 = math.exp %25 : vector<8x8xf32>
    %cst_11 = arith.constant dense<0.000000e+00> : vector<8xf32>
    %27 = vector.multi_reduction <add>, %26, %cst_11 [1] : vector<8x8xf32> to vector<8xf32>
    %28 = vector.shape_cast %27 : vector<8xf32> to vector<8x1xf32>
    %29 = tpu.reciprocal %28 {approx = true} : vector<8x1xf32> -> vector<8x1xf32>
    %30 = vector.broadcast %29 : vector<8x1xf32> to vector<8x8xf32>
    %31 = arith.mulf %26, %30 : vector<8x8xf32>
    %32 = arith.truncf %31 : vector<8x8xf32> to vector<8x8xbf16>
    %cst_12 = arith.constant dense<0.000000e+00> : vector<8x8xf32>
    %33 = tpu.matmul %32, %18, %cst_12 {dimension_numbers = #tpu.dot_dimension_numbers<[1], [0], [0], [1], [0, 0, 1, 1], [], []>} : vector<8x8xbf16>, vector<8x8xbf16>, vector<8x8xf32> -> vector<8x8xf32>
    %34 = vector.extract_strided_slice %12 {offsets = [0, 24], sizes = [8, 8], strides = [1, 1]} : vector<8x96xf32> to vector<8x8xf32>
    %35 = arith.truncf %34 : vector<8x8xf32> to vector<8x8xbf16>
    %36 = vector.extract_strided_slice %12 {offsets = [0, 32], sizes = [8, 8], strides = [1, 1]} : vector<8x96xf32> to vector<8x8xf32>
    %37 = arith.truncf %36 : vector<8x8xf32> to vector<8x8xbf16>
    %38 = vector.extract_strided_slice %12 {offsets = [0, 40], sizes = [8, 8], strides = [1, 1]} : vector<8x96xf32> to vector<8x8xf32>
    %39 = arith.truncf %38 : vector<8x8xf32> to vector<8x8xbf16>
    %cst_13 = arith.constant dense<0.000000e+00> : vector<8x8xf32>
    %40 = tpu.matmul %35, %37, %cst_13 {dimension_numbers = #tpu.dot_dimension_numbers<[1], [1], [0], [0], [0, 0, 1, 0], [], []>} : vector<8x8xbf16>, vector<8x8xbf16>, vector<8x8xf32> -> vector<8x8xf32>
    %41 = vector.broadcast %9 : vector<1x8xf32> to vector<8x8xf32>
    %42 = arith.addf %40, %41 : vector<8x8xf32>
    %cst_14 = arith.constant dense<0xFF800000> : vector<8xf32>
    %43 = vector.multi_reduction <maximumf>, %42, %cst_14 [1] : vector<8x8xf32> to vector<8xf32>
    %44 = vector.shape_cast %43 : vector<8xf32> to vector<8x1xf32>
    %45 = vector.broadcast %44 : vector<8x1xf32> to vector<8x8xf32>
    %46 = arith.subf %42, %45 : vector<8x8xf32>
    %47 = math.exp %46 : vector<8x8xf32>
    %cst_15 = arith.constant dense<0.000000e+00> : vector<8xf32>
    %48 = vector.multi_reduction <add>, %47, %cst_15 [1] : vector<8x8xf32> to vector<8xf32>
    %49 = vector.shape_cast %48 : vector<8xf32> to vector<8x1xf32>
    %50 = tpu.reciprocal %49 {approx = true} : vector<8x1xf32> -> vector<8x1xf32>
    %51 = vector.broadcast %50 : vector<8x1xf32> to vector<8x8xf32>
    %52 = arith.mulf %47, %51 : vector<8x8xf32>
    %53 = arith.truncf %52 : vector<8x8xf32> to vector<8x8xbf16>
    %cst_16 = arith.constant dense<0.000000e+00> : vector<8x8xf32>
    %54 = tpu.matmul %53, %39, %cst_16 {dimension_numbers = #tpu.dot_dimension_numbers<[1], [0], [0], [1], [0, 0, 1, 1], [], []>} : vector<8x8xbf16>, vector<8x8xbf16>, vector<8x8xf32> -> vector<8x8xf32>
    %55 = vector.extract_strided_slice %12 {offsets = [0, 48], sizes = [8, 8], strides = [1, 1]} : vector<8x96xf32> to vector<8x8xf32>
    %56 = arith.truncf %55 : vector<8x8xf32> to vector<8x8xbf16>
    %57 = vector.extract_strided_slice %12 {offsets = [0, 56], sizes = [8, 8], strides = [1, 1]} : vector<8x96xf32> to vector<8x8xf32>
    %58 = arith.truncf %57 : vector<8x8xf32> to vector<8x8xbf16>
    %59 = vector.extract_strided_slice %12 {offsets = [0, 64], sizes = [8, 8], strides = [1, 1]} : vector<8x96xf32> to vector<8x8xf32>
    %60 = arith.truncf %59 : vector<8x8xf32> to vector<8x8xbf16>
    %cst_17 = arith.constant dense<0.000000e+00> : vector<8x8xf32>
    %61 = tpu.matmul %56, %58, %cst_17 {dimension_numbers = #tpu.dot_dimension_numbers<[1], [1], [0], [0], [0, 0, 1, 0], [], []>} : vector<8x8xbf16>, vector<8x8xbf16>, vector<8x8xf32> -> vector<8x8xf32>
    %62 = vector.broadcast %9 : vector<1x8xf32> to vector<8x8xf32>
    %63 = arith.addf %61, %62 : vector<8x8xf32>
    %cst_18 = arith.constant dense<0xFF800000> : vector<8xf32>
    %64 = vector.multi_reduction <maximumf>, %63, %cst_18 [1] : vector<8x8xf32> to vector<8xf32>
    %65 = vector.shape_cast %64 : vector<8xf32> to vector<8x1xf32>
    %66 = vector.broadcast %65 : vector<8x1xf32> to vector<8x8xf32>
    %67 = arith.subf %63, %66 : vector<8x8xf32>
    %68 = math.exp %67 : vector<8x8xf32>
    %cst_19 = arith.constant dense<0.000000e+00> : vector<8xf32>
    %69 = vector.multi_reduction <add>, %68, %cst_19 [1] : vector<8x8xf32> to vector<8xf32>
    %70 = vector.shape_cast %69 : vector<8xf32> to vector<8x1xf32>
    %71 = tpu.reciprocal %70 {approx = true} : vector<8x1xf32> -> vector<8x1xf32>
    %72 = vector.broadcast %71 : vector<8x1xf32> to vector<8x8xf32>
    %73 = arith.mulf %68, %72 : vector<8x8xf32>
    %74 = arith.truncf %73 : vector<8x8xf32> to vector<8x8xbf16>
    %cst_20 = arith.constant dense<0.000000e+00> : vector<8x8xf32>
    %75 = tpu.matmul %74, %60, %cst_20 {dimension_numbers = #tpu.dot_dimension_numbers<[1], [0], [0], [1], [0, 0, 1, 1], [], []>} : vector<8x8xbf16>, vector<8x8xbf16>, vector<8x8xf32> -> vector<8x8xf32>
    %76 = vector.extract_strided_slice %12 {offsets = [0, 72], sizes = [8, 8], strides = [1, 1]} : vector<8x96xf32> to vector<8x8xf32>
    %77 = arith.truncf %76 : vector<8x8xf32> to vector<8x8xbf16>
    %78 = vector.extract_strided_slice %12 {offsets = [0, 80], sizes = [8, 8], strides = [1, 1]} : vector<8x96xf32> to vector<8x8xf32>
    %79 = arith.truncf %78 : vector<8x8xf32> to vector<8x8xbf16>
    %80 = vector.extract_strided_slice %12 {offsets = [0, 88], sizes = [8, 8], strides = [1, 1]} : vector<8x96xf32> to vector<8x8xf32>
    %81 = arith.truncf %80 : vector<8x8xf32> to vector<8x8xbf16>
    %cst_21 = arith.constant dense<0.000000e+00> : vector<8x8xf32>
    %82 = tpu.matmul %77, %79, %cst_21 {dimension_numbers = #tpu.dot_dimension_numbers<[1], [1], [0], [0], [0, 0, 1, 0], [], []>} : vector<8x8xbf16>, vector<8x8xbf16>, vector<8x8xf32> -> vector<8x8xf32>
    %83 = vector.broadcast %9 : vector<1x8xf32> to vector<8x8xf32>
    %84 = arith.addf %82, %83 : vector<8x8xf32>
    %cst_22 = arith.constant dense<0xFF800000> : vector<8xf32>
    %85 = vector.multi_reduction <maximumf>, %84, %cst_22 [1] : vector<8x8xf32> to vector<8xf32>
    %86 = vector.shape_cast %85 : vector<8xf32> to vector<8x1xf32>
    %87 = vector.broadcast %86 : vector<8x1xf32> to vector<8x8xf32>
    %88 = arith.subf %84, %87 : vector<8x8xf32>
    %89 = math.exp %88 : vector<8x8xf32>
    %cst_23 = arith.constant dense<0.000000e+00> : vector<8xf32>
    %90 = vector.multi_reduction <add>, %89, %cst_23 [1] : vector<8x8xf32> to vector<8xf32>
    %91 = vector.shape_cast %90 : vector<8xf32> to vector<8x1xf32>
    %92 = tpu.reciprocal %91 {approx = true} : vector<8x1xf32> -> vector<8x1xf32>
    %93 = vector.broadcast %92 : vector<8x1xf32> to vector<8x8xf32>
    %94 = arith.mulf %89, %93 : vector<8x8xf32>
    %95 = arith.truncf %94 : vector<8x8xf32> to vector<8x8xbf16>
    %cst_24 = arith.constant dense<0.000000e+00> : vector<8x8xf32>
    %96 = tpu.matmul %95, %81, %cst_24 {dimension_numbers = #tpu.dot_dimension_numbers<[1], [0], [0], [1], [0, 0, 1, 1], [], []>} : vector<8x8xbf16>, vector<8x8xbf16>, vector<8x8xf32> -> vector<8x8xf32>
    %97 = tpu.concatenate %33, %54, %75, %96 in 1 : vector<8x8xf32>, vector<8x8xf32>, vector<8x8xf32>, vector<8x8xf32> -> vector<8x32xf32>
    %c0_25 = arith.constant 0 : index
    %c0_26 = arith.constant 0 : index
    %c0_27 = arith.constant 0 : index
    %98 = vector.load %arg6[%c0_25, %c0_26, %c0_27] : memref<1x8x32xf32, #tpu.memory_space<vmem>>, vector<1x8x32xf32>
    %99 = vector.shape_cast %98 : vector<1x8x32xf32> to vector<8x32xf32>
    %100 = vector.shape_cast %97 : vector<8x32xf32> to vector<1x8x32xf32>
    tpu.vector_store %arg6[%c0_25, %c0_26, %c0_27], %100 {strides = array<i32>} : memref<1x8x32xf32, #tpu.memory_space<vmem>>, vector<1x8x32xf32>,
    return
  }
  func.func @transform_0(%arg0: i32, %arg1: i32) -> (i32, i32, i32) {
    %c0_i32 = arith.constant 0 : i32
    %c0_i32_0 = arith.constant 0 : i32
    %c0_i32_1 = arith.constant 0 : i32
    return %arg0, %c0_i32, %c0_i32_0 : i32, i32, i32
  }
  func.func @transform_1(%arg0: i32, %arg1: i32) -> (i32, i32, i32) {
    %c0_i32 = arith.constant 0 : i32
    %c0_i32_0 = arith.constant 0 : i32
    %c0_i32_1 = arith.constant 0 : i32
    return %arg0, %c0_i32, %c0_i32_0 : i32, i32, i32
  }
  func.func @transform_2(%arg0: i32, %arg1: i32) -> (i32, i32, i32) {
    %c0_i32 = arith.constant 0 : i32
    %c0_i32_0 = arith.constant 0 : i32
    %c0_i32_1 = arith.constant 0 : i32
    %c0_i32_2 = arith.constant 0 : i32
    return %c0_i32, %c0_i32_0, %c0_i32_1 : i32, i32, i32
  }
  func.func @transform_3(%arg0: i32, %arg1: i32) -> (i32, i32, i32) {
    %c0_i32 = arith.constant 0 : i32
    %c0_i32_0 = arith.constant 0 : i32
    %c0_i32_1 = arith.constant 0 : i32
    %c0_i32_2 = arith.constant 0 : i32
    return %c0_i32, %c0_i32_0, %c0_i32_1 : i32, i32, i32
  }
  func.func @transform_4(%arg0: i32, %arg1: i32) -> (i32, i32, i32) {
    %c0_i32 = arith.constant 0 : i32
    %c0_i32_0 = arith.constant 0 : i32
    return %arg0, %c0_i32, %arg1 : i32, i32, i32
  }
}

</mosaic_0001>

<bundles_post_ra>
// kernel: tpu_custom_call.1
= control target key start
LH: loop header
LB: loop body
LE: loop exit
PB: predicated region body
PF: predicated region fallthrough
CT: control target
= control target key end

     0   :  { %s1269_s0 = inlined_call_operand.hbm [shape: bf16[2,8,32], index: 0, kind: input, shape index: {}]   ;;  %s1270_s1 = inlined_call_operand.hbm [shape: f32[2,1,8], index: 1, kind: input, shape index: {}]   ;;  %s1271_s2 = inlined_call_operand.hbm [shape: bf16[1,32,96], index: 2, kind: input, shape index: {}]   ;;  %s1272_s3 = inlined_call_operand.vmem [shape: f32[1,1,96], index: 3, kind: input, shape index: {}]   ;;  %s1273_s4 = inlined_call_operand.hbm [shape: f32[2,8,32], index: 4, kind: output, shape index: {}]  }
   0x1   :  { %1277 = sst [smem:[#allocation17_spill]] %s1271_s2 }
   0x2   :  { %9 = vsyncpa [#allocation3], 0 }
   0x3   :  { %11 = vsyncpa [#allocation3 + $0x1], 0 }
   0x4   :  { %12 = vsyncpa [#allocation6], 0 }
   0x5   :  { %14 = vsyncpa [#allocation6 + $0x1], 0 }
   0x6   :  { %15 = vsyncpa [#allocation4], 0 }
   0x7   :  { %17 = vsyncpa [#allocation4 + $0x1], 0  ;;  %s1068_s15 = smov 0   ;;  %s1070_s16 = smov 0  }
   0x8   :  { %s1072_s17 = smov 0   ;;  %s1074_s18 = smov 0  }
   0x9   :  { %s1076_s19 = smov 0   ;;  %s1078_s20 = smov 0  }
   0xa LB: > { %1278 = sst [smem:[#allocation13_spill]] %s1012_s17  ;;  %s1099_s21 = sadd.s32 4294967295, %s1024_s20   ;;  %s1024_s20 = sphi %s1078_s20, %s23_s20   ;;  %s1020_s19 = sphi %s1076_s19, %s1295_s19   ;;  %s1016_s18 = sphi %s1074_s18, %s1294_s18   ;;  %s1012_s17 = sphi %s1072_s17, %s1290_s17   ;;  %s1008_s16 = sphi %s1070_s16, %s1293_s16   ;;  %s1004_s15 = sphi %s1068_s15, %s1292_s15  }
   0xb   : > { %p700_p0 = scmp.ge.s32.totalorder %s1024_s20, 1  ;;  %p56_p1 = scmp.eq.s32.totalorder %s1099_s21, 0 }
   0xc   : > { %p162_p2 = scmp.lt.s32.totalorder %s1024_s20, 3  ;;  %s1279_s2 = sld [smem:[#allocation17_spill]] }
   0xd   : > { %s1026_s26 = smov [#allocation7]   ;;  %p702_p6 = scmp.ge.s32.totalorder %s1024_s20, 2 }
   0xe   : > { %p1107_p3 = pnand %p700_p0, %p162_p2  ;;  %s175_s27 = sshll.u32 %s1026_s26, 4  ;;  %s176_s27 = int_to_ptr.vmem [resolvable:$true] %s175_s27 }
   0xf   : > { %s1027_s28 = smov 64   ;;  %s1028_s29 = smov 4  }
  0x10   : > { %p742_p4 = pneg %p1107_p3  ;;  %s699_s30 = sadd.s32 4294967294, %s1024_s20  }
  0x11   : > { %s35_s5 = sadd.s32 1, %s1020_s19  ;;  %s42_s6 = sadd.s32 1, %s1012_s17 }
  0x12   : > { %s173_s24 = sshll.u32 %s1279_s2, 4  ;;  %p743_p5 = pnand %p742_p4, %p56_p1  ;;  %s174_s24 = int_to_ptr.hbm [resolvable:$true] %s173_s24 }
  0x13   : > { %p37_p7 = scmp.ge.s32.totalorder %s35_s5, 2  ;;  %p49_p8 = scmp.ne.s32.totalorder %s1012_s17, %s1008_s16 }
  0x14   : > { %745 = dma.hbm_to_vmem [thread:$0]  (!%p743_p5), %s174_s24, 256, %s176_s27, [#allocation6], %s1027_s28, %s1027_s28, %s1028_s29  }
  0x15   : > { %p50_p9 = scmp.eq.s32.totalorder %s1024_s20, 0  ;;  %p55_p10 = scmp.ne.s32.totalorder %s1008_s16, %s1004_s15 }
  0x16   : > { %s1297_s5 = smov (%p37_p7, %s35_s5), 0  ;;  %p149_p13 = scmp.eq.s32.totalorder %s1099_s21, 1 }
  0x17   : > { %1281 = sst [smem:[#allocation14_spill]] %s1297_s5  ;;  %p1126_p11 = por %p50_p9, %p49_p8 }
  0x18   : > { %p1132_p12 = por %p56_p1, %p55_p10  ;;  %s39_s9 = ssub.s32 %s1020_s19, %s1297_s5 }
  0x19   : > { %p40_p0 = scmp.eq.s32.totalorder %s39_s9, 0  ;;  %p155_p2 = scmp.eq.s32.totalorder %s699_s30, 1 }
  0x1a   : > { %p1139_p4 = por %p149_p13, %p49_p8  ;;  %p758_p5 = scmp.lt.s32.totalorder %s1024_s20, 2 }
  0x1b   : > { %s1145_s11 = scalar_select %p40_p0, %s1012_s17, %s42_s6  }
  0x1c   : > { %p1147_p7 = por %p155_p2, %p55_p10  ;;  %s192_s13 = sand.u32 1, %s1012_s17  }
  0x1d   : > { %1285 = sst [smem:[#allocation15_spill]] %s1145_s11  ;;  %s703_s14 = sshll.u32 %s192_s13, 2 }
  0x1e   : > { %s1286_s12 = scalar_select %p1147_p7, 1, 0 }
  0x1f   : > { %s704_s22 = sshll.u32 %s1020_s19, 2  ;;  %s196_s27 = scalar_lea.vmem [#allocation2], %s703_s14 }
  0x20   : > { %1287 = sst [smem:[#allocation16_spill]] %s1286_s12  ;;  %s200_s26 = scalar_lea.hbm %s1269_s0, %s704_s22 }
  0x21   : > { %s204_s28 = sshll.u32 %s196_s27, 4  ;;  %s202_s29 = sshll.u32 %s200_s26, 4  ;;  %s205_s28 = int_to_ptr.vmem [resolvable:$true] %s204_s28  ;;  %s203_s29 = int_to_ptr.hbm [resolvable:$true] %s202_s29 }
  0x22   : > { %p747_p8 = pnand %p758_p5, %p1126_p11  ;;  %s211_s30 = sand.u32 1, %s1024_s20  }
  0x23   : > { %s193_s6 = scalar_lea.sflag [#allocation3], %s192_s13  ;;  %s217_s5 = scalar_lea.hbm %s1270_s1, %s1020_s19 }
  0x24   : > { %749 = dma.hbm_to_vmem [thread:$0]  (!%p747_p8), %s203_s29, 64, %s205_s28, %s193_s6  }
  0x25   : > { %s214_s11 = scalar_lea.vmem [#allocation5], %s192_s13  ;;  %s219_s12 = sshll.u32 %s217_s5, 4  ;;  %s220_s12 = int_to_ptr.hbm [resolvable:$true] %s219_s12 }
  0x26   : > { %s221_s17 = sshll.u32 %s214_s11, 4  ;;  %s212_s22 = scalar_lea.sflag [#allocation6], %s211_s30  ;;  %s222_s17 = int_to_ptr.vmem [resolvable:$true] %s221_s17 }
  0x27   : > { %752 = dma.hbm_to_vmem [thread:$0]  (!%p747_p8), %s220_s12, 16, %s222_s17, %s212_s22  }
  0x28   : > { %230 = sbr.rel (%p1107_p3) target bundleno = 994 (0x3e2), region = 36  ;;  %s1166_s7 = sand.u32 (!%p1107_p3), 1, %s1008_s16  }
  0x29   : > { %s706_s14 = sshll.u32 (!%p1107_p3), %s1166_s7, 2  ;;  %s233_s23 = scalar_lea.sflag (!%p1107_p3), [#allocation3], %s1166_s7 }
  0x2a   : > { %s236_s2 = scalar_lea.vmem (!%p1107_p3), [#allocation2], %s706_s14 }
  0x2d   : > { %987 = dma.done.wait (%p1132_p12), %s233_s23, 64  }
  0x2e   : > { %989 = vsyncadd (%p1132_p12), %s233_s23, 4294967232  ;;  %s242_s17 = sand.u32 1, %s1099_s21   ;;  %s245_s5 = scalar_lea.vmem [#allocation5], %s1166_s7 }
  0x2f   : > { %s243_s25 = scalar_lea.sflag [#allocation6], %s242_s17 }
  0x30   : > { %991 = dma.done.wait (%p1132_p12), %s243_s25, 16  }
  0x31   : > { %993 = vsyncadd (%p1132_p12), %s243_s25, 4294967280 }
  0x32   : > { %995 = dma.done.wait (%p56_p1), [#allocation6], 256  }
  0x33   : > { %997 = vsyncadd (%p56_p1), [#allocation6], 4294967040  ;;  %v731_v0 = vld [vmem:[#allocation7 + $0x8] sm:$0xff]  ;;  %v730_v1 = vld [vmem:[#allocation7] sm:$0xff]  ;;  %vm307_vm0 = vcmask 261120   ;;  %s1029_s8 = smov 56  }
  0x34   : > { %317 = vmatpush.bf16.msra.mxu0 %v731_v0  ;;  %v281_v2 = vld [vmem:[%s236_s2] sm:$0xf]  ;;  %s1030_s21 = smov 104   ;;  %s1031_s13 = smov 120   ;;  %vm331_vm1 = vcmask 64512   ;;  %vm368_vm2 = vcmask 1043456  }
  0x35   : > { %v826_v3 = vld [vmem:[%s1272_s3] ss:$0 sm:$0xff]  ;;  %s1032_s24 = smov 72   ;;  %s1033_s26 = smov 48   ;;  %vm566_vm3 = vcmask 130048   ;;  %vm568_vm4 = vcmask 195584  }
  0x36   : > { %s1034_s27 = smov 96   ;;  %s1035_s28 = smov 80   ;;  %v827_v19 = vld [vmem:[%s245_s5] ss:$0 sm:$0xff] }
  0x37   : > { %s1036_s29 = smov 112   ;;  %s1037_s30 = smov 40  }
  0x38   : > { %318 = vmatpush.bf16.msra.mxu0 %v730_v1  ;;  %s1038_s6 = smov 88   ;;  %s1039_s9 = smov 64  }
  0x39   : > { %s1040_s22 = smov 8   ;;  %s1041_s14 = smov 16  }
  0x3a   : > { %s1042_s23 = smov 24   ;;  %s708_s2 = sshll.u32 %s1166_s7, 3 }
  0x3b   : > { %717 = vmatmul.msk.bf16.vlgmr.msra.gmra.mxu0 %vm307_vm0, %v281_v2  ;;  %s727_s17 = sshll.u32 %s1016_s18, 3  ;;  %s279_s12 = scalar_lea.vmem [#allocation8], %s708_s2 }
  0x3c   : > { %s583_s11 = scalar_lea.hbm %s1273_s4, %s727_s17  ;;  %s572_s18 = scalar_lea.sflag [#allocation4], %s1166_s7 }
  0xb8   : > { %v320_v4 = vpop.f32.mrf.mxu0 }
  0xb9   : > { %v321_v5 = vadd.f32 %v826_v3, %v320_v4 }
  0xbb   : > { %v1188_v6 = vpack.c.bf16 %v321_v5, %v321_v5 }
  0xbd   : > { %497 = vrot.lane.b32.xlu2 %v1188_v6, %s1029_s8  ;;  %385 = vrot.lane.b32.xlu1 %v1188_v6, %s1030_s21  ;;  %s585_s8 = sshll.u32 %s279_s12, 4  ;;  %s587_s21 = sshll.u32 %s583_s11, 4  ;;  %s586_s8 = int_to_ptr.vmem [resolvable:$true] %s585_s8  ;;  %s588_s21 = int_to_ptr.hbm [resolvable:$true] %s587_s21 }
  0xbe   : > { %329 = vrot.lane.b32.xlu0 %v1188_v6, %s1031_s13  ;;  %s948_s13 = sshra.s32 %s588_s21, 4  ;;  %s949_s13 = int_to_ptr.hbm [resolvable:$true] %s948_s13 }
  0xbf   : > { %p955_p10 = scmp.lt.s32.totalorder %s949_s13, %s1273_s4 }
  0xc0   : > { %v322_v7 = vpop.f32.mrf.mxu0 }
  0xc5   : > { %443 = vrot.lane.b32.xlu2 %v1188_v6, %s1032_s24  ;;  %499 = vrot.lane.b32.xlu1 %v1188_v6, %s1033_s26  ;;  %s950_s24 = scalar_lea.hbm %s949_s13, 8 }
  0xc6   : > { %387 = vrot.lane.b32.xlu0 %v1188_v6, %s1034_s27  ;;  %p951_p1 = scmp.ne.s32.totalorder %s949_s13, %s950_s24 }
  0xc8   : > { %p952_p3 = pnand %p951_p1, %p1139_p4 }
  0xca   : > { %p953_p9 = pneg %p952_p3 }
  0xce   : > { %441 = vrot.lane.b32.xlu0 %v1188_v6, %s1035_s28  ;;  %s954_s28 = scalar_lea.hbm %s1273_s4, 16 }
  0xcf   : > { %p956_p11 = scmp.lt.s32.totalorder %s954_s28, %s950_s24 }
  0xd1   : > { %p957_p12 = por %p956_p11, %p955_p10 }
  0xd3   : > { %p958_p13 = pnand %p957_p12, %p953_p9 }
 0x117   : > { %v498_v8 = vpop.permute.xlu2 %497 }
 0x11f   : > { %v444_v9 = vpop.permute.xlu2 %443 }
 0x120   : > { %v449_v10 = vsel %vm331_vm1, %v444_v9, 0 }
 0x121   : > { %458 = vmatpush.bf16.xpose.msrb.mxu0 %v449_v10 }
 0x12f   : > { %v386_v11 = vpop.permute.xlu1 %385 }
 0x130   : > { %v330_v12 = vpop.permute.xlu0 %329 }
 0x131   : > { %v336_v13 = vsel %vm331_vm1, %v330_v12, 0 }
 0x132   : > { %345 = vmatpush.bf16.xpose.msra.mxu1 %v336_v13 }
 0x137   : > { %v500_v14 = vpop.permute.xlu1 %499 }
 0x138   : > { %v388_v15 = vpop.permute.xlu0 %387  ;;  %v505_v16 = vsel %vm331_vm1, %v500_v14, 0 }
 0x139   : > { %718 = vmatmul.msk.bf16.vlgmr.msra.gmra.mxu1 %vm331_vm1, %v1188_v6  ;;  %v393_v17 = vsel %vm331_vm1, %v388_v15, 0 }
 0x13a   : > { %402 = vmatpush.bf16.xpose.msra.mxu3 %v393_v17 }
 0x140   : > { %v442_v18 = vpop.permute.xlu0 %441 }
 0x141   : > { %720 = vmatmul.msk.bf16.vlgmr.msra.gmra.mxu3 %vm331_vm1, %v386_v11  ;;  %722 = vmatmul.msk.bf16.vlgmr.msrb.gmra.mxu0 %vm331_vm1, %v442_v18 }
 0x142   : > { %514 = vmatpush.bf16.xpose.msrb.mxu3 %v505_v16 }
 0x151   : > { %724 = vmatmul.msk.bf16.vlgmr.msrb.gmra.mxu3 %vm331_vm1, %v498_v8 }
 0x1b6   : > { %v347_v20 = vpop.f32.mrf.mxu1 }
 0x1b7   : > { %v348_v21 = vadd.f32 %v827_v19, %v347_v20 }
 0x1b9   : > { %v351_v22 = vsel %vm331_vm1, %v348_v21, -inf }
 0x1ba   : > { %352 = vmax.xlane.f32.xlu1 %v351_v22 }
 0x1be   : > { %v349_v23 = vpop.f32.mrf.mxu1  ;;  %v460_v24 = vpop.f32.mrf.mxu0 }
 0x1bf   : > { %v461_v29 = vadd.f32 %v827_v19, %v460_v24 }
 0x1c1   : > { %v464_v31 = vsel %vm331_vm1, %v461_v29, -inf }
 0x1c4   : > { %v404_v25 = vpop.f32.mrf.mxu3 }
 0x1c5   : > { %v405_v26 = vadd.f32 %v827_v19, %v404_v25 }
 0x1c6   : > { %v462_v27 = vpop.f32.mrf.mxu0 }
 0x1c7   : > { %v408_v28 = vsel %vm331_vm1, %v405_v26, -inf }
 0x1c8   : > { %409 = vmax.xlane.f32.xlu2 %v408_v28 }
 0x1cc   : > { %v406_v30 = vpop.f32.mrf.mxu3 }
 0x1d0   : > { %465 = vmax.xlane.f32.xlu2 %v464_v31 }
 0x1d4   : > { %v516_v32 = vpop.f32.mrf.mxu3 }
 0x1d5   : > { %v517_v33 = vadd.f32 %v827_v19, %v516_v32 }
 0x1d7   : > { %v520_v34 = vsel %vm331_vm1, %v517_v33, -inf }
 0x1d8   : > { %521 = vmax.xlane.f32.xlu0 %v520_v34 }
 0x1dc   : > { %v518_v35 = vpop.f32.mrf.mxu3 }
 0x1e8   : > { %363 = vrot.lane.b32.xlu2 %v1188_v6, %s1036_s29 }
 0x1f0   : > { %532 = vrot.lane.b32.xlu2 %v1188_v6, %s1037_s30 }
 0x22d   : > { %v353_v36 = vpop.xlane.xlu1 %352 }
 0x22e   : > { %v354_v37 = vsub.f32 %v348_v21, %v353_v36 }
 0x230   : > { %v355_v38 = vmul.f32 1.442695, %v354_v37 }
 0x232   : > { %828 = vpow2.f32 %v355_v38 }
 0x238   : > { %v829_v39 = vpop.eup %828 }
 0x239   : > { %v357_v40 = vsel %vm331_vm1, %v829_v39, 0.0 }
 0x23a   : > { %358 = vadd.xlane.f32.xlu1 %v357_v40 }
 0x23b   : > { %v410_v41 = vpop.xlane.xlu2 %409 }
 0x23c   : > { %v411_v44 = vsub.f32 %v405_v26, %v410_v41 }
 0x23e   : > { %v412_v46 = vmul.f32 1.442695, %v411_v44 }
 0x243   : > { %v466_v42 = vpop.xlane.xlu2 %465 }
 0x244   : > { %v467_v43 = vsub.f32 %v461_v29, %v466_v42 }
 0x246   : > { %v468_v45 = vmul.f32 1.442695, %v467_v43 }
 0x248   : > { %830 = vpow2.f32 %v468_v45 }
 0x249   : > { %832 = vpow2.f32 %v412_v46 }
 0x24b   : > { %v364_v47 = vpop.permute.xlu2 %363  ;;  %v522_v48 = vpop.xlane.xlu0 %521 }
 0x24c   : > { %v370_v49 = vsel %vm368_vm2, %v364_v47, 0  ;;  %v523_v51 = vsub.f32 %v517_v33, %v522_v48 }
 0x24d   : > { %379 = vmatpush.bf16.msra.mxu2 %v370_v49 }
 0x24e   : > { %v831_v50 = vpop.eup %830  ;;  %v524_v53 = vmul.f32 1.442695, %v523_v51 }
 0x24f   : > { %v470_v52 = vsel %vm331_vm1, %v831_v50, 0.0  ;;  %v833_v54 = vpop.eup %832 }
 0x250   : > { %471 = vadd.xlane.f32.xlu0 %v470_v52  ;;  %834 = vpow2.f32 %v524_v53  ;;  %v414_v55 = vsel %vm331_vm1, %v833_v54, 0.0 }
 0x253   : > { %420 = vrot.lane.b32.xlu1 %v1188_v6, %s1038_s6  ;;  %v533_v63 = vpop.permute.xlu2 %532 }
 0x254   : > { %v538_v2 = vsel %vm368_vm2, %v533_v63, 0 }
 0x256   : > { %v835_v56 = vpop.eup %834 }
 0x257   : > { %v526_v57 = vsel %vm331_vm1, %v835_v56, 0.0 }
 0x258   : > { %415 = vadd.xlane.f32.xlu0 %v414_v55 }
 0x260   : > { %527 = vadd.xlane.f32.xlu0 %v526_v57 }
 0x274   : > { %476 = vrot.lane.b32.xlu0 %v1188_v6, %s1039_s9 }
 0x2ad   : > { %v359_v58 = vpop.xlane.xlu1 %358 }
 0x2ae   : > { %836 = vrcp.f32 %v359_v58 }
 0x2b4   : > { %v837_v59 = vpop.eup %836 }
 0x2b5   : > { %v361_v60 = vmul.f32 %v837_v59, %v829_v39 }
 0x2b7   : > { %v362_v61 = vpack.c.bf16 %v361_v60, %v361_v60 }
 0x2b9   : > { %719 = vmatmul.msk.bf16.vlgmr.msra.gmra.mxu2 %vm331_vm1, %v362_v61 }
 0x2c3   : > { %v472_v62 = vpop.xlane.xlu0 %471 }
 0x2c5   : > { %v421_v0 = vpop.permute.xlu1 %420 }
 0x2c6   : > { %v426_v1 = vsel %vm368_vm2, %v421_v0, 0 }
 0x2c7   : > { %435 = vmatpush.bf16.msrb.mxu2 %v426_v1 }
 0x2cb   : > { %547 = vmatpush.bf16.msra.mxu2 %v538_v2  ;;  %v416_v3 = vpop.xlane.xlu0 %415 }
 0x2cc   : > { %838 = vrcp.f32 %v416_v3 }
 0x2d2   : > { %v839_v4 = vpop.eup %838 }
 0x2d3   : > { %v418_v5 = vmul.f32 %v839_v4, %v833_v54  ;;  %v528_v6 = vpop.xlane.xlu0 %527 }
 0x2d4   : > { %840 = vrcp.f32 %v528_v6 }
 0x2d5   : > { %v419_v7 = vpack.c.bf16 %v418_v5, %v418_v5  ;;  %842 = vrcp.f32 %v472_v62 }
 0x2d7   : > { %721 = vmatmul.msk.bf16.vlgmr.msrb.gmra.mxu2 %vm331_vm1, %v419_v7 }
 0x2da   : > { %v841_v8 = vpop.eup %840 }
 0x2db   : > { %v530_v9 = vmul.f32 %v841_v8, %v835_v56  ;;  %v843_v10 = vpop.eup %842 }
 0x2dc   : > { %v474_v11 = vmul.f32 %v843_v10, %v831_v50 }
 0x2dd   : > { %v531_v12 = vpack.c.bf16 %v530_v9, %v530_v9 }
 0x2de   : > { %v475_v15 = vpack.c.bf16 %v474_v11, %v474_v11 }
 0x2e6   : > { %v477_v13 = vpop.permute.xlu0 %476 }
 0x2e7   : > { %725 = vmatmul.msk.bf16.vlgmr.msra.gmra.mxu2 %vm331_vm1, %v531_v12  ;;  %v482_v14 = vsel %vm368_vm2, %v477_v13, 0 }
 0x2e8   : > { %491 = vmatpush.bf16.msrb.mxu1 %v482_v14 }
 0x2eb   : > { %723 = vmatmul.msk.bf16.vlgmr.msrb.gmra.mxu1 %vm331_vm1, %v475_v15 }
 0x33c   : > { %v381_v16 = vpop.f32.mrf.mxu2 }
 0x344   : > { %v383_v17 = vpop.f32.mrf.mxu2 }
 0x35a   : > { %v437_v18 = vpop.f32.mrf.mxu2 }
 0x35b   : > { %554 = vrot.lane.b32.xlu1 %v437_v18, %s1040_s22 }
 0x362   : > { %v439_v19 = vpop.f32.mrf.mxu2 }
 0x368   : > { %v493_v20 = vpop.f32.mrf.mxu1 }
 0x369   : > { %558 = vrot.lane.b32.xlu2 %v493_v20, %s1041_s14 }
 0x36a   : > { %v549_v21 = vpop.f32.mrf.mxu2 }
 0x36b   : > { %562 = vrot.lane.b32.xlu1 %v549_v21, %s1042_s23 }
 0x370   : > { %v495_v22 = vpop.f32.mrf.mxu1 }
 0x372   : > { %v551_v23 = vpop.f32.mrf.mxu2 }
 0x3c3   : > { %v559_v26 = vpop.permute.xlu2 %558 }
 0x3cd   : > { %v555_v24 = vpop.permute.xlu1 %554 }
 0x3ce   : > { %v565_v25 = vsel %vm331_vm1, %v381_v16, %v555_v24 }
 0x3cf   : > { %v567_v28 = vsel %vm566_vm3, %v565_v25, %v559_v26 }
 0x3dd   : > { %v563_v27 = vpop.permute.xlu1 %562 }
 0x3de   : > { %v569_v29 = vsel %vm568_vm4, %v567_v28, %v563_v27 }
 0x3df   : > { %570 = vst.msk [vmem:[%s279_s12] sm:$0xff] %vm307_vm0, %v569_v29 }
 0x3e0   : > { %961 = shalt.err (!%p958_p13)
}
 0x3e1   : > { %740 = dma.vmem_to_hbm [thread:$0]  (%p1139_p4), %s586_s8, 128, %s588_s21, %s572_s18  }
 0x3e2 PF: > { %s599_s6 = sand.u32 1, %s1004_s15   ;;  %p754_p0 = pnand %p702_p6, %p1147_p7 }
 0x3e3   : > { %s600_s9 = scalar_lea.sflag [#allocation4], %s599_s6 }
 0x3e4   : > { %p755_p2 = pneg %p754_p0 }
 0x3e6   : > { %999 = dma.done.wait (%p755_p2), %s600_s9, 128  }
 0x3e7   : > { %1001 = vsyncadd (%p755_p2), %s600_s9, 4294967168  ;;  %s23_s20 = sadd.s32 1, %s1024_s20   ;;  %s1289_s22 = sld [smem:[#allocation13_spill]] }
 0x3e8   : > { %p20_p5 = scmp.ge.s32.totalorder %s23_s20, 4   ;;  %s1290_s17 = sld [smem:[#allocation15_spill]] }
 0x3e9   : > { %s1291_s10 = sld [smem:[#allocation14_spill]]  ;;  %s1292_s15 = smov %s1008_s16 }
 0x3ea   : > { %s1294_s18 = smov %s1020_s19 }
 0x3eb   :  { %22 = sbr.rel (!%p20_p5) target bundleno = 10 (0xa), region = 100 }
 0x3ed   : > { %s1293_s16 = smov %s1289_s22 }
 0x3ef   : > { %s1295_s19 = smov %s1291_s10 }
 0x3f0   :  { %606 = vsyncpa [#allocation3], 1 }
 0x3f1   :  { %608 = vsyncpa [#allocation3 + $0x1], 1 }
 0x3f2   :  { %609 = vsyncpa [#allocation6], 1 }
 0x3f3   :  { %611 = vsyncpa [#allocation6 + $0x1], 1 }
 0x3f4   :  { %612 = vsyncpa [#allocation4], 1 }
 0x3f5   :  { %614 = vsyncpa [#allocation4 + $0x1], 1 }

</bundles_post_ra>
